<compile_context>
chip_gen: v7x
topology: tpu7x:2x2x1
jax: 0.10.0
libtpu: 0.0.40
codegen_flags: <defaults>
</compile_context>

<pallas_src>
import jax
import jax.numpy as jnp
from jax.experimental import pallas as pl
from jax.experimental.pallas import tpu as pltpu


def _round_up(a, m):
    return (a + m - 1) // m * m


def _make_mlp_kernel(n_inputs):
    """Kernel over one batch tile: 3 Linear layers with ReLU between, layer-1
    weight split row-wise across the n_inputs concatenated input pieces."""

    def kernel(*refs):
        x_refs = refs[:n_inputs]
        w1_refs = refs[n_inputs:2 * n_inputs]
        b1_ref, w2_ref, b2_ref, w3_ref, b3_ref, out_ref = refs[2 * n_inputs:]

        # Layer 1: split matmul == matmul on the concatenation (no xc concat).
        h = jnp.dot(x_refs[0][...], w1_refs[0][...],
                    preferred_element_type=jnp.float32)
        for x_r, w_r in zip(x_refs[1:], w1_refs[1:]):
            h = h + jnp.dot(x_r[...], w_r[...],
                            preferred_element_type=jnp.float32)
        h = jnp.maximum(h + b1_ref[...], 0.0)          # f32 bias/ReLU on VPU

        # Layer 2: Linear + ReLU (cast operand only for the MXU, f32 accum).
        h = jnp.dot(h.astype(w2_ref.dtype), w2_ref[...],
                    preferred_element_type=jnp.float32)
        h = jnp.maximum(h + b2_ref[...], 0.0)

        # Layer 3: Linear (no activation).
        y = jnp.dot(h.astype(w3_ref.dtype), w3_ref[...],
                    preferred_element_type=jnp.float32) + b3_ref[...]
        out_ref[...] = y.astype(out_ref.dtype)

    return kernel


def nn_task_forward(params, x, c, c_extra=None, *,
                    compute_dtype=jnp.float32, tile_b=512):
    """Forward pass of NN_TASK as one fused Pallas kernel over a batch grid.

    compute_dtype: dtype of the matmul operands (activations + weights);
      accumulation is always f32 and biases / ReLU stay f32.
    tile_b: target rows per grid step; rounded to a multiple of 16 and
      clamped to the (padded) batch size.
    """
    pieces = [x, c] + ([c_extra] if c_extra is not None else [])
    piece_dims = [int(p.shape[1]) for p in pieces]
    in_dim = sum(piece_dims)
    assert params["w1"].shape[0] == in_dim, "w1 in_dim mismatch"
    out_dim = int(params["w3"].shape[1])
    B = int(x.shape[0])

    # Batch tiling: multiple-of-16 rows (valid sublane tile for f32 & bf16);
    # pad B so the grid divides evenly, slice the rows back off at the end.
    tb = _round_up(max(16, min(tile_b, _round_up(B, 16))), 16)
    B_pad = _round_up(B, tb)
    grid = (B_pad // tb,)

    # Split W1 row-wise to match the (x, c, c_extra) concatenation order.
    offs = [0]
    for d in piece_dims:
        offs.append(offs[-1] + d)
    w1 = params["w1"].astype(compute_dtype)
    w1_pieces = [w1[offs[i]:offs[i + 1], :] for i in range(len(pieces))]
    w2 = params["w2"].astype(compute_dtype)
    w3 = params["w3"].astype(compute_dtype)
    b1 = params["b1"].astype(jnp.float32)
    b2 = params["b2"].astype(jnp.float32)
    b3 = params["b3"].astype(jnp.float32)

    pieces = [jnp.pad(p.astype(compute_dtype), ((0, B_pad - B), (0, 0)))
              for p in pieces]

    def row_spec(d):
        return pl.BlockSpec((tb, d), lambda i: (i, 0))

    def full_spec(a):                      # same block every step -> VMEM-resident
        return pl.BlockSpec(a.shape, lambda i: (0, 0))

    in_specs = ([row_spec(d) for d in piece_dims]
                + [full_spec(w) for w in w1_pieces]
                + [full_spec(b1), full_spec(w2), full_spec(b2),
                   full_spec(w3), full_spec(b3)])

    out = pl.pallas_call(
        _make_mlp_kernel(len(pieces)),
        out_shape=jax.ShapeDtypeStruct((B_pad, out_dim), jnp.float32),
        grid=grid,
        in_specs=in_specs,
        out_specs=pl.BlockSpec((tb, out_dim), lambda i: (i, 0)),
        compiler_params=pltpu.CompilerParams(
            dimension_semantics=("parallel",)),   # v7x: shard batch across 2 TCs
    )(*pieces, *w1_pieces, b1, w2, b2, w3, b3)

    return out[:B]


def init_nn_task_params(key, in_dim, out_dim_class):
    """Deterministic init mimicking nn.Linear default (U(-1/sqrt(fan_in), +)).
    Weights stored as (in_features, out_features); biases kept 2-D (1, N)."""
    h1 = in_dim // 2
    h2 = in_dim // 4
    dims = [(in_dim, h1), (h1, h2), (h2, out_dim_class)]
    params = {}
    for i, (fan_in, fan_out) in enumerate(dims, start=1):
        key, kw, kb = jax.random.split(key, 3)
        bound = 1.0 / (fan_in ** 0.5)
        params[f"w{i}"] = jax.random.uniform(
            kw, (fan_in, fan_out), jnp.float32, minval=-bound, maxval=bound)
        params[f"b{i}"] = jax.random.uniform(
            kb, (1, fan_out), jnp.float32, minval=-bound, maxval=bound)
    return params


def _reference_forward(params, x, c, c_extra=None):
    """Pure-JAX reference for correctness check."""
    if c_extra is not None:
        c = jnp.concatenate((c, c_extra), axis=1)
    xc = jnp.concatenate((x, c), axis=1)
    h1 = jnp.maximum(xc @ params["w1"] + params["b1"], 0.0)
    h2 = jnp.maximum(h1 @ params["w2"] + params["b2"], 0.0)
    return h2 @ params["w3"] + params["b3"]


if __name__ == "__main__":
    # Small shapes implied by forward(): x:(B, dx), c:(B, dc), c_extra:(B, de)
    B, dx, dc, de = 8, 20, 8, 4
    out_dim_class = 4

    key = jax.random.PRNGKey(0)
    key, kx, kc, ke = jax.random.split(key, 4)
    x = jax.random.normal(kx, (B, dx), jnp.float32)
    c = jax.random.normal(kc, (B, dc), jnp.float32)
    c_extra = jax.random.normal(ke, (B, de), jnp.float32)

    # Case 1: with c_extra (in_dim = dx + dc + de = 32), f32 operands.
    key, k1 = jax.random.split(key)
    params3 = init_nn_task_params(k1, dx + dc + de, out_dim_class)
    y = jax.block_until_ready(nn_task_forward(params3, x, c, c_extra))
    y_ref = _reference_forward(params3, x, c, c_extra)
    assert y.shape == (B, out_dim_class)
    assert jnp.allclose(y, y_ref, atol=1e-5, rtol=1e-5)

    # Case 2: without c_extra (in_dim = dx + dc = 28).
    key, k2 = jax.random.split(key)
    params2 = init_nn_task_params(k2, dx + dc, out_dim_class)
    y2 = jax.block_until_ready(nn_task_forward(params2, x, c))
    y2_ref = _reference_forward(params2, x, c)
    assert jnp.allclose(y2, y2_ref, atol=1e-5, rtol=1e-5)

    # Case 3: bf16 activation/weight stream with f32 accumulation (perf path).
    y3 = jax.block_until_ready(
        nn_task_forward(params3, x, c, c_extra, compute_dtype=jnp.bfloat16))
    assert jnp.allclose(y3, y_ref, atol=5e-2, rtol=5e-2)

    print("KERNEL_OK")
</pallas_src>

<mosaic_0001>
module attributes {stable_mosaic.version = 11 : i64} {
  func.func @kernel(%arg0: i32, %arg1: memref<16x20xf32, #tpu.memory_space<vmem>>, %arg2: memref<16x8xf32, #tpu.memory_space<vmem>>, %arg3: memref<16x4xf32, #tpu.memory_space<vmem>>, %arg4: memref<20x16xf32, #tpu.memory_space<vmem>>, %arg5: memref<8x16xf32, #tpu.memory_space<vmem>>, %arg6: memref<4x16xf32, #tpu.memory_space<vmem>>, %arg7: memref<1x16xf32, #tpu.memory_space<vmem>>, %arg8: memref<16x8xf32, #tpu.memory_space<vmem>>, %arg9: memref<1x8xf32, #tpu.memory_space<vmem>>, %arg10: memref<8x4xf32, #tpu.memory_space<vmem>>, %arg11: memref<1x4xf32, #tpu.memory_space<vmem>>, %arg12: memref<16x4xf32, #tpu.memory_space<vmem>>) attributes {dimension_semantics = [#tpu.dimension_semantics<parallel>], iteration_bounds = array<i64: 1>, scalar_prefetch = 0 : i64, scratch_operands = 0 : i64, tpu.core_type = #tpu.core_type<tc>, window_params = [{transform_indices = @transform_0, window_bounds = array<i64: 16, 20>}, {transform_indices = @transform_1, window_bounds = array<i64: 16, 8>}, {transform_indices = @transform_2, window_bounds = array<i64: 16, 4>}, {pipeline_mode = #tpu.pipeline_mode<synchronous>, transform_indices = @transform_3, window_bounds = array<i64: 20, 16>}, {pipeline_mode = #tpu.pipeline_mode<synchronous>, transform_indices = @transform_4, window_bounds = array<i64: 8, 16>}, {pipeline_mode = #tpu.pipeline_mode<synchronous>, transform_indices = @transform_5, window_bounds = array<i64: 4, 16>}, {pipeline_mode = #tpu.pipeline_mode<synchronous>, transform_indices = @transform_6, window_bounds = array<i64: 1, 16>}, {pipeline_mode = #tpu.pipeline_mode<synchronous>, transform_indices = @transform_7, window_bounds = array<i64: 16, 8>}, {pipeline_mode = #tpu.pipeline_mode<synchronous>, transform_indices = @transform_8, window_bounds = array<i64: 1, 8>}, {pipeline_mode = #tpu.pipeline_mode<synchronous>, transform_indices = @transform_9, window_bounds = array<i64: 8, 4>}, {pipeline_mode = #tpu.pipeline_mode<synchronous>, transform_indices = @transform_10, window_bounds = array<i64: 1, 4>}, {transform_indices = @transform_11, window_bounds = array<i64: 16, 4>}]} {
    %c0 = arith.constant 0 : index
    %c0_0 = arith.constant 0 : index
    %0 = vector.load %arg1[%c0, %c0_0] : memref<16x20xf32, #tpu.memory_space<vmem>>, vector<16x20xf32>
    %c0_1 = arith.constant 0 : index
    %c0_2 = arith.constant 0 : index
    %1 = vector.load %arg4[%c0_1, %c0_2] : memref<20x16xf32, #tpu.memory_space<vmem>>, vector<20x16xf32>
    %cst = arith.constant dense<0.000000e+00> : vector<16x16xf32>
    %2 = tpu.matmul %0, %1, %cst {dimension_numbers = #tpu.dot_dimension_numbers<[1], [0], [0], [1], [0, 0, 1, 1], [], []>} : vector<16x20xf32>, vector<20x16xf32>, vector<16x16xf32> -> vector<16x16xf32>
    %c0_3 = arith.constant 0 : index
    %c0_4 = arith.constant 0 : index
    %3 = vector.load %arg2[%c0_3, %c0_4] : memref<16x8xf32, #tpu.memory_space<vmem>>, vector<16x8xf32>
    %c0_5 = arith.constant 0 : index
    %c0_6 = arith.constant 0 : index
    %4 = vector.load %arg5[%c0_5, %c0_6] : memref<8x16xf32, #tpu.memory_space<vmem>>, vector<8x16xf32>
    %cst_7 = arith.constant dense<0.000000e+00> : vector<16x16xf32>
    %5 = tpu.matmul %3, %4, %cst_7 {dimension_numbers = #tpu.dot_dimension_numbers<[1], [0], [0], [1], [0, 0, 1, 1], [], []>} : vector<16x8xf32>, vector<8x16xf32>, vector<16x16xf32> -> vector<16x16xf32>
    %6 = arith.addf %2, %5 : vector<16x16xf32>
    %c0_8 = arith.constant 0 : index
    %c0_9 = arith.constant 0 : index
    %7 = vector.load %arg3[%c0_8, %c0_9] : memref<16x4xf32, #tpu.memory_space<vmem>>, vector<16x4xf32>
    %c0_10 = arith.constant 0 : index
    %c0_11 = arith.constant 0 : index
    %8 = vector.load %arg6[%c0_10, %c0_11] : memref<4x16xf32, #tpu.memory_space<vmem>>, vector<4x16xf32>
    %cst_12 = arith.constant dense<0.000000e+00> : vector<16x16xf32>
    %9 = tpu.matmul %7, %8, %cst_12 {dimension_numbers = #tpu.dot_dimension_numbers<[1], [0], [0], [1], [0, 0, 1, 1], [], []>} : vector<16x4xf32>, vector<4x16xf32>, vector<16x16xf32> -> vector<16x16xf32>
    %10 = arith.addf %6, %9 : vector<16x16xf32>
    %c0_13 = arith.constant 0 : index
    %c0_14 = arith.constant 0 : index
    %11 = vector.load %arg7[%c0_13, %c0_14] : memref<1x16xf32, #tpu.memory_space<vmem>>, vector<1x16xf32>
    %12 = vector.broadcast %11 : vector<1x16xf32> to vector<16x16xf32>
    %13 = arith.addf %10, %12 : vector<16x16xf32>
    %cst_15 = arith.constant 0.000000e+00 : f32
    %14 = vector.broadcast %cst_15 : f32 to vector<16x16xf32>
    %15 = arith.maximumf %13, %14 : vector<16x16xf32>
    %c0_16 = arith.constant 0 : index
    %c0_17 = arith.constant 0 : index
    %16 = vector.load %arg8[%c0_16, %c0_17] : memref<16x8xf32, #tpu.memory_space<vmem>>, vector<16x8xf32>
    %cst_18 = arith.constant dense<0.000000e+00> : vector<16x8xf32>
    %17 = tpu.matmul %15, %16, %cst_18 {dimension_numbers = #tpu.dot_dimension_numbers<[1], [0], [0], [1], [0, 0, 1, 1], [], []>} : vector<16x16xf32>, vector<16x8xf32>, vector<16x8xf32> -> vector<16x8xf32>
    %c0_19 = arith.constant 0 : index
    %c0_20 = arith.constant 0 : index
    %18 = vector.load %arg9[%c0_19, %c0_20] : memref<1x8xf32, #tpu.memory_space<vmem>>, vector<1x8xf32>
    %19 = vector.broadcast %18 : vector<1x8xf32> to vector<16x8xf32>
    %20 = arith.addf %17, %19 : vector<16x8xf32>
    %cst_21 = arith.constant 0.000000e+00 : f32
    %21 = vector.broadcast %cst_21 : f32 to vector<16x8xf32>
    %22 = arith.maximumf %20, %21 : vector<16x8xf32>
    %c0_22 = arith.constant 0 : index
    %c0_23 = arith.constant 0 : index
    %23 = vector.load %arg10[%c0_22, %c0_23] : memref<8x4xf32, #tpu.memory_space<vmem>>, vector<8x4xf32>
    %cst_24 = arith.constant dense<0.000000e+00> : vector<16x4xf32>
    %24 = tpu.matmul %22, %23, %cst_24 {dimension_numbers = #tpu.dot_dimension_numbers<[1], [0], [0], [1], [0, 0, 1, 1], [], []>} : vector<16x8xf32>, vector<8x4xf32>, vector<16x4xf32> -> vector<16x4xf32>
    %c0_25 = arith.constant 0 : index
    %c0_26 = arith.constant 0 : index
    %25 = vector.load %arg11[%c0_25, %c0_26] : memref<1x4xf32, #tpu.memory_space<vmem>>, vector<1x4xf32>
    %26 = vector.broadcast %25 : vector<1x4xf32> to vector<16x4xf32>
    %27 = arith.addf %24, %26 : vector<16x4xf32>
    %c0_27 = arith.constant 0 : index
    %c0_28 = arith.constant 0 : index
    %28 = vector.load %arg12[%c0_27, %c0_28] : memref<16x4xf32, #tpu.memory_space<vmem>>, vector<16x4xf32>
    tpu.vector_store %arg12[%c0_27, %c0_28], %27 {strides = array<i32>} : memref<16x4xf32, #tpu.memory_space<vmem>>, vector<16x4xf32>,
    return
  }
  func.func @transform_0(%arg0: i32) -> (i32, i32) {
    %c0_i32 = arith.constant 0 : i32
    %c0_i32_0 = arith.constant 0 : i32
    return %arg0, %c0_i32 : i32, i32
  }
  func.func @transform_1(%arg0: i32) -> (i32, i32) {
    %c0_i32 = arith.constant 0 : i32
    %c0_i32_0 = arith.constant 0 : i32
    return %arg0, %c0_i32 : i32, i32
  }
  func.func @transform_2(%arg0: i32) -> (i32, i32) {
    %c0_i32 = arith.constant 0 : i32
    %c0_i32_0 = arith.constant 0 : i32
    return %arg0, %c0_i32 : i32, i32
  }
  func.func @transform_3(%arg0: i32) -> (i32, i32) {
    %c0_i32 = arith.constant 0 : i32
    %c0_i32_0 = arith.constant 0 : i32
    %c0_i32_1 = arith.constant 0 : i32
    return %c0_i32, %c0_i32_0 : i32, i32
  }
  func.func @transform_4(%arg0: i32) -> (i32, i32) {
    %c0_i32 = arith.constant 0 : i32
    %c0_i32_0 = arith.constant 0 : i32
    %c0_i32_1 = arith.constant 0 : i32
    return %c0_i32, %c0_i32_0 : i32, i32
  }
  func.func @transform_5(%arg0: i32) -> (i32, i32) {
    %c0_i32 = arith.constant 0 : i32
    %c0_i32_0 = arith.constant 0 : i32
    %c0_i32_1 = arith.constant 0 : i32
    return %c0_i32, %c0_i32_0 : i32, i32
  }
  func.func @transform_6(%arg0: i32) -> (i32, i32) {
    %c0_i32 = arith.constant 0 : i32
    %c0_i32_0 = arith.constant 0 : i32
    %c0_i32_1 = arith.constant 0 : i32
    return %c0_i32, %c0_i32_0 : i32, i32
  }
  func.func @transform_7(%arg0: i32) -> (i32, i32) {
    %c0_i32 = arith.constant 0 : i32
    %c0_i32_0 = arith.constant 0 : i32
    %c0_i32_1 = arith.constant 0 : i32
    return %c0_i32, %c0_i32_0 : i32, i32
  }
  func.func @transform_8(%arg0: i32) -> (i32, i32) {
    %c0_i32 = arith.constant 0 : i32
    %c0_i32_0 = arith.constant 0 : i32
    %c0_i32_1 = arith.constant 0 : i32
    return %c0_i32, %c0_i32_0 : i32, i32
  }
  func.func @transform_9(%arg0: i32) -> (i32, i32) {
    %c0_i32 = arith.constant 0 : i32
    %c0_i32_0 = arith.constant 0 : i32
    %c0_i32_1 = arith.constant 0 : i32
    return %c0_i32, %c0_i32_0 : i32, i32
  }
  func.func @transform_10(%arg0: i32) -> (i32, i32) {
    %c0_i32 = arith.constant 0 : i32
    %c0_i32_0 = arith.constant 0 : i32
    %c0_i32_1 = arith.constant 0 : i32
    return %c0_i32, %c0_i32_0 : i32, i32
  }
  func.func @transform_11(%arg0: i32) -> (i32, i32) {
    %c0_i32 = arith.constant 0 : i32
    %c0_i32_0 = arith.constant 0 : i32
    return %arg0, %c0_i32 : i32, i32
  }
}

</mosaic_0001>

<bundles_post_ra>
// kernel: tpu_custom_call.1
= control target key start
LH: loop header
LB: loop body
LE: loop exit
PB: predicated region body
PF: predicated region fallthrough
CT: control target
= control target key end

     0   :  { %vm128_vm0 = vcmask 162816   ;;  %vm135_vm1 = vcmask 1043456   ;;  %vm46_vm2 = vcmask 64512   ;;  %vm217_vm3 = vcmask 31744   ;;  %s710_s3 = inlined_call_operand.vmem [shape: f32[20,16], index: 3, kind: input, shape index: {}]   ;;  %s711_s0 = inlined_call_operand.vmem [shape: f32[16,20], index: 0, kind: input, shape index: {}]   ;;  %s712_s4 = inlined_call_operand.vmem [shape: f32[8,16], index: 4, kind: input, shape index: {}]   ;;  %s713_s1 = inlined_call_operand.vmem [shape: f32[16,8], index: 1, kind: input, shape index: {}]   ;;  %s714_s5 = inlined_call_operand.vmem [shape: f32[4,16], index: 5, kind: input, shape index: {}]   ;;  %s715_s2 = inlined_call_operand.vmem [shape: f32[16,4], index: 2, kind: input, shape index: {}]   ;;  %s716_s7 = inlined_call_operand.vmem [shape: f32[16,8], index: 7, kind: input, shape index: {}]   ;;  %s717_s6 = inlined_call_operand.vmem [shape: f32[1,16], index: 6, kind: input, shape index: {}]   ;;  %s718_s9 = inlined_call_operand.vmem [shape: f32[8,4], index: 9, kind: input, shape index: {}]   ;;  %s719_s8 = inlined_call_operand.vmem [shape: f32[1,8], index: 8, kind: input, shape index: {}]   ;;  %s720_s10 = inlined_call_operand.vmem [shape: f32[1,4], index: 10, kind: input, shape index: {}]   ;;  %s721_s11 = inlined_call_operand.vmem [shape: f32[16,4], index: 11, kind: output, shape index: {}]  }
   0x1   :  { %v40_v0 = vld [vmem:[%s710_s3] sm:$0xff]  ;;  %v41_v1 = vld [vmem:[%s710_s3 + $0x8] sm:$0xff]  ;;  %v42_v4 = vld [vmem:[%s710_s3 + $0x10] sm:$0xf]  ;;  %vm324_vm4 = vcmask 130048  }
   0x2   :  { %v567_v2 = vpack.c.bf16 %v41_v1, %v40_v0  ;;  %v38_v3 = vld [vmem:[%s711_s0] sm:$0xff]  ;;  %v44_v7 = vld [vmem:[%s713_s1 + $0x8] sm:$0xff] }
   0x3   :  { %547 = vmatprep.mubr.msk.f32.mxu0 %vm128_vm0, %v38_v3  ;;  %v45_v5 = vld [vmem:[%s712_s4] sm:$0xff]  ;;  %v39_v8 = vld [vmem:[%s711_s0 + $0x8] sm:$0xff] }
   0x4   :  { %v43_v6 = vld [vmem:[%s713_s1] sm:$0xff]  ;;  %568 = vmatprep.subr.bf16.mxu0 %v567_v2  ;;  %536 = vmatprep.subr.mxu1 %v45_v5  ;;  %v215_v11 = vld [vmem:[%s715_s2 + $0x8] sm:$0xff] }
   0x5   :  { %570 = vmatpush3.bf16.msra.mxu0 %v567_v2  ;;  %537 = vmatpush3.msra.mxu1 %v45_v5  ;;  %v216_v9 = vld [vmem:[%s714_s5] sm:$0xf]  ;;  %v316_v13 = vld [vmem:[%s716_s7 + $0x8] sm:$0xff] }
   0x6   :  { %545 = vmatprep.subr.msk.mxu0 %vm135_vm1, %v42_v4  ;;  %538 = vmatprep.mubr.msk.f32.mxu1 %vm46_vm2, %v43_v6  ;;  %v214_v10 = vld [vmem:[%s715_s2] sm:$0xff] }
   0x7   :  { %539 = vmatmul.mubr.msk.f32.vlgmr.msra.gmra.mrb[0].mxu1 %vm46_vm2, %v44_v7  ;;  %v315_v12 = vld [vmem:[%s716_s7] sm:$0xff] }
   0x8   :  { %v571_v14 = vpack.c.bf16 %v316_v13, %v315_v12  ;;  %v511_v18 = vld [vmem:[%s717_s6] ss:$0 sm:$0xff] }
   0x9   :  { %546 = vmatpush3.msk.msra.mxu0 %vm135_vm1, %v42_v4  ;;  %v408_v26 = vld [vmem:[%s718_s9] sm:$0xff] }
   0xa   :  { %548 = vmatmul.mubr.msk.f32.vlgmr.msra.gmra.mrb[0].mxu0 %vm128_vm0, %v39_v8  ;;  %550 = vmatprep.subr.msk.mxu0 %vm135_vm1, %v216_v9  ;;  %v512_v27 = vld [vmem:[%s719_s8] ss:$0 sm:$0xff] }
   0xb   :  { %551 = vmatpush3.msk.msra.mxu0 %vm135_vm1, %v216_v9  ;;  %552 = vmatprep.mubr.msk.f32.mxu0 %vm217_vm3, %v214_v10  ;;  %v515_v34 = vld [vmem:[%s720_s10] ss:$0 sm:$0xff] }
   0xc   :  { %572 = vmatprep.subr.bf16.mxu1 %v571_v14 }
   0xd   :  { %574 = vmatpush3.bf16.msra.mxu1 %v571_v14 }
   0xe   :  { %562 = vmatprep.subr.mxu1 %v408_v26 }
  0x12   :  { %553 = vmatmul.mubr.msk.f32.vlgmr.msra.gmra.mrb[0].mxu0 %vm217_vm3, %v215_v11 }
  0xda   :  { %v540_v15 = vpop.f32.mrb[0].mxu1 }
  0xdb   :  { %v119_v16 = vpop.f32.mrb[1].mxu1 }
  0xe5   :  { %v554_v17 = vpop.f32.mrb[0].mxu0 }
  0xe6   :  { %v575_v19 = vadd.f32 %v554_v17, %v540_v15  ;;  %v293_v20 = vpop.f32.mrb[1].mxu0 }
  0xe7   :  { %v576_v21 = vadd.f32 %v293_v20, %v119_v16 }
  0xe8   :  { %v312_v22 = vadd.f32 %v575_v19, %v511_v18 }
  0xe9   :  { %v311_v23 = vadd.f32 %v576_v21, %v511_v18 }
  0xea   :  { %v314_v25 = vmax.f32 %v312_v22, 0.0 }
  0xeb   :  { %v313_v24 = vmax.f32 %v311_v23, 0.0 }
  0xed   :  { %559 = vmatprep.mubr.msk.f32.mxu1 %vm324_vm4, %v313_v24 }
  0xee   :  { %560 = vmatmul.mubr.msk.f32.vlgmr.msra.gmra.mrb[2].mxu1 %vm324_vm4, %v314_v25 }
  0xef   :  { %563 = vmatpush3.msra.mxu1 %v408_v26 }
 0x1c1   :  { %v561_v28 = vpop.f32.mrb[2].mxu1 }
 0x1c2   :  { %v403_v29 = vadd.f32 %v561_v28, %v512_v27  ;;  %v397_v30 = vpop.f32.mrb[3].mxu1 }
 0x1c3   :  { %v398_v31 = vadd.f32 %v512_v27, %v397_v30 }
 0x1c4   :  { %v407_v33 = vmax.f32 %v403_v29, 0.0 }
 0x1c5   :  { %v406_v32 = vmax.f32 %v398_v31, 0.0 }
 0x1c7   :  { %564 = vmatprep.mubr.msk.f32.mxu1 %vm46_vm2, %v406_v32 }
 0x1c8   :  { %565 = vmatmul.mubr.msk.f32.vlgmr.msra.gmra.mrb[4].mxu1 %vm46_vm2, %v407_v33 }
 0x29b   :  { %v566_v35 = vpop.f32.mrb[4].mxu1 }
 0x29c   :  { %v494_v36 = vadd.f32 %v566_v35, %v515_v34  ;;  %v488_v37 = vpop.f32.mrb[5].mxu1 }
 0x29d   :  { %v489_v38 = vadd.f32 %v515_v34, %v488_v37 }
 0x29e   :  { %498 = vst.msk [vmem:[%s721_s11 + $0x8] sm:$0xff] %vm217_vm3, %v494_v36 }
 0x29f   :  { %497 = vst.msk [vmem:[%s721_s11] sm:$0xff] %vm217_vm3, %v489_v38 }

</bundles_post_ra>
